<compile_context>
chip_gen: v6e
topology: v6e:2x2x1
jax: 0.10.0
libtpu: 0.0.40
codegen_flags: <defaults>
</compile_context>

<pallas_src>
import jax
import jax.numpy as jnp
from jax.experimental import pallas as pl
from jax.experimental.pallas import tpu as pltpu


# ----------------------------------------------------------------------------
# Tiled linear kernel:  y = x @ w + b
# ----------------------------------------------------------------------------

def _linear_kernel(x_ref, w_ref, b_ref, o_ref):
    o_ref[...] = (jnp.dot(x_ref[...], w_ref[...],
                          preferred_element_type=jnp.float32)
                  + b_ref[...])


def linear(x, w, b, *, bn=256, bv=512):
    """x: [N, F] @ w: [F, V] + b: [1, V] -> [N, V].

    Requires N % 8 == 0 and V % 128 == 0 (callers pad).  Tiled over (N, V)
    with a parallel grid so it generalizes to large vocabularies.
    """
    N, F = x.shape
    V = w.shape[1]
    bn = min(bn, N)
    bv = min(bv, V)
    return pl.pallas_call(
        _linear_kernel,
        out_shape=jax.ShapeDtypeStruct((N, V), jnp.float32),
        grid_spec=pltpu.PrefetchScalarGridSpec(
            num_scalar_prefetch=0,
            grid=(pl.cdiv(N, bn), pl.cdiv(V, bv)),
            in_specs=[pl.BlockSpec((bn, F), lambda i, j: (i, 0)),
                      pl.BlockSpec((F, bv), lambda i, j: (0, j)),
                      pl.BlockSpec((1, bv), lambda i, j: (0, j))],
            out_specs=pl.BlockSpec((bn, bv), lambda i, j: (i, j)),
        ),
        compiler_params=pltpu.CompilerParams(
            dimension_semantics=("parallel", "parallel")),
    )(x, w, b)


# ----------------------------------------------------------------------------
# Fused bidirectional LSTM recurrence
# ----------------------------------------------------------------------------

def _bilstm_kernel(gx_ref, whh_ref, h0_ref, c0_ref,
                   out_ref, hN_ref, cN_ref, h_sc, c_sc):
    """grid = (2 directions, T time steps).

    gx_ref : [T, B, 4H]  precomputed x @ W_ih^T + bias for this direction
    whh_ref: [H, 4H]     pre-transposed recurrent weights for this direction
    out_ref: [T, B, H]   resident in VMEM across the time loop
    """
    d = pl.program_id(0)
    t = pl.program_id(1)
    T = pl.num_programs(1)
    H = h_sc.shape[-1]

    @pl.when(t == 0)
    def _():
        h_sc[...] = h0_ref[...]
        c_sc[...] = c0_ref[...]

    # Backward direction walks time in reverse; handled purely by indexing
    # the VMEM-resident blocks (no HBM-side flips anywhere).
    src = jnp.where(d == 0, t, T - 1 - t)

    h_prev = h_sc[...]                                   # [B, H]
    c_prev = c_sc[...]                                   # [B, H]

    gates = gx_ref[src] + jnp.dot(h_prev, whh_ref[...],
                                  preferred_element_type=jnp.float32)  # [B, 4H]

    # Activations on the full 4H(=128)-lane slab (2 EUP passes), then slice.
    # PyTorch gate order: i, f, g, o.
    sig = jax.nn.sigmoid(gates)
    th = jnp.tanh(gates)
    i_g = sig[:, 0 * H:1 * H]
    f_g = sig[:, 1 * H:2 * H]
    g_g = th[:, 2 * H:3 * H]
    o_g = sig[:, 3 * H:4 * H]

    c_new = f_g * c_prev + i_g * g_g
    h_new = o_g * jnp.tanh(c_new)

    h_sc[...] = h_new
    c_sc[...] = c_new
    out_ref[src] = h_new

    @pl.when(t == T - 1)
    def _():
        hN_ref[...] = h_new
        cN_ref[...] = c_new


def bilstm(gates_x, w_hh_T, h0, c0):
    """Fused bidirectional LSTM recurrence.

    gates_x: [T, B, 8H]   columns [:4H] = forward dir, [4H:] = backward dir
    w_hh_T : [2, H, 4H]   pre-transposed recurrent weights (fwd, bwd)
    h0, c0 : [2, B, H]
    Returns: out [2, T, B, H] (both directions in natural time order),
             h_n [2, B, H], c_n [2, B, H]
    """
    T, B, G2 = gates_x.shape
    H = h0.shape[-1]
    assert G2 == 8 * H
    f32 = jnp.float32
    return pl.pallas_call(
        _bilstm_kernel,
        out_shape=(jax.ShapeDtypeStruct((2, T, B, H), f32),
                   jax.ShapeDtypeStruct((2, B, H), f32),
                   jax.ShapeDtypeStruct((2, B, H), f32)),
        grid_spec=pltpu.PrefetchScalarGridSpec(
            num_scalar_prefetch=0,
            grid=(2, T),
            in_specs=[
                # Per-direction [T, B, 4H] input-projection slab, resident
                # across the time loop (block index along last axis = d).
                pl.BlockSpec((T, B, 4 * H), lambda d, t: (0, 0, d)),
                pl.BlockSpec((None, H, 4 * H), lambda d, t: (d, 0, 0)),
                pl.BlockSpec((None, B, H), lambda d, t: (d, 0, 0)),
                pl.BlockSpec((None, B, H), lambda d, t: (d, 0, 0)),
            ],
            out_specs=[
                pl.BlockSpec((None, T, B, H), lambda d, t: (d, 0, 0, 0)),
                pl.BlockSpec((None, B, H), lambda d, t: (d, 0, 0)),
                pl.BlockSpec((None, B, H), lambda d, t: (d, 0, 0)),
            ],
            scratch_shapes=[pltpu.VMEM((B, H), f32),
                            pltpu.VMEM((B, H), f32)],
        ),
        compiler_params=pltpu.CompilerParams(
            dimension_semantics=("parallel", "arbitrary")),
    )(gates_x, w_hh_T, h0, c0)


# ----------------------------------------------------------------------------
# Parameter preparation (one-time, wrapper side)
# ----------------------------------------------------------------------------

def prepare_params(raw):
    """Pre-transpose / concatenate / pad weights into kernel-friendly layouts."""
    V = raw["emb_table"].shape[0]
    Vp = ((V + 127) // 128) * 128
    return {
        "emb_table": raw["emb_table"],
        # [E, 8H]: forward gate columns [:4H], backward gate columns [4H:]
        "w_ih_T_both": jnp.concatenate([raw["w_ih_f"].T, raw["w_ih_b"].T], axis=1),
        "b_both": jnp.concatenate([raw["b_f"], raw["b_b"]], axis=1),       # [1, 8H]
        "w_hh_T": jnp.stack([raw["w_hh_f"].T, raw["w_hh_b"].T], axis=0),   # [2,H,4H]
        "dec_w_pad": jnp.pad(raw["dec_w"], ((0, 0), (0, Vp - V))),         # [2H,Vp]
        "dec_b_pad": jnp.pad(raw["dec_b"], ((0, 0), (0, Vp - V))),         # [1, Vp]
    }


# ----------------------------------------------------------------------------
# RNNModel forward (direction='both', rnn_type='LSTM', nlayers=1)
# ----------------------------------------------------------------------------

def rnn_model_forward(params, tokens, hidden):
    """tokens: [T, B] int32, hidden = (h0 [2, B, H], c0 [2, B, H]).

    Returns (decoded [T, B, V], word_repre [T, B, 2H], (h_n, c_n))."""
    h0, c0 = hidden
    T, B = tokens.shape
    H = h0.shape[-1]
    V = params["emb_table"].shape[0]

    # Embedding lookup (gather) + dropout (identity in eval mode).
    emb = params["emb_table"][tokens]                          # [T, B, E]
    E = emb.shape[-1]

    # Hoisted input projection + bias fold for BOTH directions:
    #   [T*B, E] @ [E, 8H] + [1, 8H]  ->  [T, B, 8H]
    gates_x = linear(emb.reshape(T * B, E),
                     params["w_ih_T_both"],
                     params["b_both"]).reshape(T, B, 8 * H)

    # Fused bidirectional LSTM recurrence (single pallas_call, grid (2, T)).
    out_fb, h_n, c_n = bilstm(gates_x, params["w_hh_T"], h0, c0)
    out_f, out_b = out_fb[0], out_fb[1]                        # [T, B, H] each

    # forward_both: shift forward states right, backward states left, concat.
    zeros_row = jnp.zeros((1, B, H), jnp.float32)
    output = jnp.concatenate(
        [jnp.concatenate([zeros_row, out_f[:-1]], axis=0),
         jnp.concatenate([out_b[1:], zeros_row], axis=0)], axis=-1)   # [T,B,2H]

    # Decoder Linear(2H -> V); vocab padded to a 128-lane multiple, sliced off.
    decoded_flat = linear(output.reshape(T * B, 2 * H),
                          params["dec_w_pad"], params["dec_b_pad"])[:, :V]
    decoded = decoded_flat.reshape(T, B, V)

    return decoded, output, (h_n, c_n)


# ----------------------------------------------------------------------------
# Pure-JAX reference for verification (uses raw PyTorch-layout params)
# ----------------------------------------------------------------------------

def _lstm_ref(x, w_ih, w_hh, b, h0, c0):
    H = h0.shape[-1]

    def step(carry, x_t):
        h, c = carry
        g = x_t @ w_ih.T + h @ w_hh.T + b[0]
        i = jax.nn.sigmoid(g[:, :H])
        f = jax.nn.sigmoid(g[:, H:2 * H])
        gg = jnp.tanh(g[:, 2 * H:3 * H])
        o = jax.nn.sigmoid(g[:, 3 * H:])
        c = f * c + i * gg
        h = o * jnp.tanh(c)
        return (h, c), h

    (hN, cN), out = jax.lax.scan(step, (h0, c0), x)
    return out, hN, cN


def rnn_model_forward_ref(params, tokens, hidden):
    h0, c0 = hidden
    T, B = tokens.shape
    H = h0.shape[-1]
    emb = params["emb_table"][tokens]
    out_f, hN_f, cN_f = _lstm_ref(emb, params["w_ih_f"], params["w_hh_f"],
                                  params["b_f"], h0[0], c0[0])
    out_b_rev, hN_b, cN_b = _lstm_ref(emb[::-1], params["w_ih_b"],
                                      params["w_hh_b"], params["b_b"],
                                      h0[1], c0[1])
    out_b = out_b_rev[::-1]
    zeros_row = jnp.zeros((1, B, H), jnp.float32)
    output = jnp.concatenate(
        [jnp.concatenate([zeros_row, out_f[:-1]], 0),
         jnp.concatenate([out_b[1:], zeros_row], 0)], axis=-1)
    decoded = (output.reshape(T * B, 2 * H) @ params["dec_w"]
               + params["dec_b"][0]).reshape(T, B, -1)
    return decoded, output, (jnp.stack([hN_f, hN_b]), jnp.stack([cN_f, cN_b]))


# ----------------------------------------------------------------------------
# Main
# ----------------------------------------------------------------------------

if __name__ == "__main__":
    T, B = 8, 2          # seq_len, nbatch
    E, H = 32, 32        # tok_emb, tok_hid
    V = 40               # tok_len (vocab)
    init_range = 0.1
    k = 1.0 / jnp.sqrt(H)

    key = jax.random.PRNGKey(0)
    ks = jax.random.split(key, 12)

    def u(kk, shape, lo, hi):
        return jax.random.uniform(kk, shape, jnp.float32, lo, hi)

    raw_params = {
        "emb_table": u(ks[0], (V, E), -init_range, init_range),
        # forward-direction LSTM params (PyTorch layout: [4H, E], [4H, H])
        "w_ih_f": u(ks[1], (4 * H, E), -k, k),
        "w_hh_f": u(ks[2], (4 * H, H), -k, k),
        "b_f": u(ks[3], (1, 4 * H), -k, k) + u(ks[4], (1, 4 * H), -k, k),
        # backward-direction LSTM params
        "w_ih_b": u(ks[5], (4 * H, E), -k, k),
        "w_hh_b": u(ks[6], (4 * H, H), -k, k),
        "b_b": u(ks[7], (1, 4 * H), -k, k) + u(ks[8], (1, 4 * H), -k, k),
        # decoder Linear(2H -> V); stored pre-transposed as [2H, V]
        "dec_w": u(ks[9], (V, 2 * H), -init_range, init_range).T,
        "dec_b": jnp.zeros((1, V), jnp.float32),
    }

    tokens = jax.random.randint(ks[10], (T, B), 0, V, dtype=jnp.int32)
    hidden = (jnp.zeros((2, B, H), jnp.float32),
              jnp.zeros((2, B, H), jnp.float32))

    # One-time wrapper-side weight layout prep (pre-transpose / concat / pad).
    params = prepare_params(raw_params)

    decoded, word_repre, (h_n, c_n) = jax.jit(rnn_model_forward)(
        params, tokens, hidden)
    jax.block_until_ready((decoded, word_repre, h_n, c_n))

    # Sanity check against a pure-JAX reference.
    d_ref, o_ref, (h_ref, c_ref) = rnn_model_forward_ref(
        raw_params, tokens, hidden)
    assert decoded.shape == (T, B, V)
    assert word_repre.shape == (T, B, 2 * H)
    assert h_n.shape == (2, B, H) and c_n.shape == (2, B, H)
    assert jnp.allclose(decoded, d_ref, atol=2e-3, rtol=2e-2)
    assert jnp.allclose(word_repre, o_ref, atol=2e-3, rtol=2e-2)
    assert jnp.allclose(h_n, h_ref, atol=2e-3, rtol=2e-2)
    assert jnp.allclose(c_n, c_ref, atol=2e-3, rtol=2e-2)

    print("KERNEL_OK")
</pallas_src>

<mosaic_0001>
module attributes {stable_mosaic.version = 11 : i64} {
  func.func @_linear_kernel(%arg0: i32, %arg1: i32, %arg2: memref<16x64xf32, #tpu.memory_space<vmem>>, %arg3: memref<64x128xf32, #tpu.memory_space<vmem>>, %arg4: memref<1x128xf32, #tpu.memory_space<vmem>>, %arg5: memref<16x128xf32, #tpu.memory_space<vmem>>) attributes {dimension_semantics = [#tpu.dimension_semantics<parallel>, #tpu.dimension_semantics<parallel>], iteration_bounds = array<i64: 1, 1>, scalar_prefetch = 0 : i64, scratch_operands = 0 : i64, tpu.core_type = #tpu.core_type<tc>, window_params = [{transform_indices = @transform_0, window_bounds = array<i64: 16, 64>}, {transform_indices = @transform_1, window_bounds = array<i64: 64, 128>}, {transform_indices = @transform_2, window_bounds = array<i64: 1, 128>}, {transform_indices = @transform_3, window_bounds = array<i64: 16, 128>}]} {
    %c0 = arith.constant 0 : index
    %c0_0 = arith.constant 0 : index
    %0 = vector.load %arg2[%c0, %c0_0] : memref<16x64xf32, #tpu.memory_space<vmem>>, vector<16x64xf32>
    %c0_1 = arith.constant 0 : index
    %c0_2 = arith.constant 0 : index
    %1 = vector.load %arg3[%c0_1, %c0_2] : memref<64x128xf32, #tpu.memory_space<vmem>>, vector<64x128xf32>
    %cst = arith.constant dense<0.000000e+00> : vector<16x128xf32>
    %2 = tpu.matmul %0, %1, %cst {dimension_numbers = #tpu.dot_dimension_numbers<[1], [0], [0], [1], [0, 0, 1, 1], [], []>} : vector<16x64xf32>, vector<64x128xf32>, vector<16x128xf32> -> vector<16x128xf32>
    %c0_3 = arith.constant 0 : index
    %c0_4 = arith.constant 0 : index
    %3 = vector.load %arg4[%c0_3, %c0_4] : memref<1x128xf32, #tpu.memory_space<vmem>>, vector<1x128xf32>
    %4 = vector.broadcast %3 : vector<1x128xf32> to vector<16x128xf32>
    %5 = arith.addf %2, %4 : vector<16x128xf32>
    %c0_5 = arith.constant 0 : index
    %c0_6 = arith.constant 0 : index
    %6 = vector.load %arg5[%c0_5, %c0_6] : memref<16x128xf32, #tpu.memory_space<vmem>>, vector<16x128xf32>
    tpu.vector_store %arg5[%c0_5, %c0_6], %5 {strides = array<i32>} : memref<16x128xf32, #tpu.memory_space<vmem>>, vector<16x128xf32>,
    return
  }
  func.func @transform_0(%arg0: i32, %arg1: i32) -> (i32, i32) {
    %c0_i32 = arith.constant 0 : i32
    %c0_i32_0 = arith.constant 0 : i32
    return %arg0, %c0_i32 : i32, i32
  }
  func.func @transform_1(%arg0: i32, %arg1: i32) -> (i32, i32) {
    %c0_i32 = arith.constant 0 : i32
    %c0_i32_0 = arith.constant 0 : i32
    return %c0_i32, %arg1 : i32, i32
  }
  func.func @transform_2(%arg0: i32, %arg1: i32) -> (i32, i32) {
    %c0_i32 = arith.constant 0 : i32
    %c0_i32_0 = arith.constant 0 : i32
    return %c0_i32, %arg1 : i32, i32
  }
  func.func @transform_3(%arg0: i32, %arg1: i32) -> (i32, i32) {
    %c0_i32 = arith.constant 0 : i32
    return %arg0, %arg1 : i32, i32
  }
}

module attributes {stable_mosaic.version = 11 : i64} {
  func.func @_linear_kernel(%arg0: i32, %arg1: i32, %arg2: memref<16x32xf32, #tpu.memory_space<vmem>>, %arg3: memref<32x256xf32, #tpu.memory_space<vmem>>, %arg4: memref<1x256xf32, #tpu.memory_space<vmem>>, %arg5: memref<16x256xf32, #tpu.memory_space<vmem>>) attributes {dimension_semantics = [#tpu.dimension_semantics<parallel>, #tpu.dimension_semantics<parallel>], iteration_bounds = array<i64: 1, 1>, scalar_prefetch = 0 : i64, scratch_operands = 0 : i64, tpu.core_type = #tpu.core_type<tc>, window_params = [{transform_indices = @transform_0, window_bounds = array<i64: 16, 32>}, {transform_indices = @transform_1, window_bounds = array<i64: 32, 256>}, {transform_indices = @transform_2, window_bounds = array<i64: 1, 256>}, {transform_indices = @transform_3, window_bounds = array<i64: 16, 256>}]} {
    %c0 = arith.constant 0 : index
    %c0_0 = arith.constant 0 : index
    %0 = vector.load %arg2[%c0, %c0_0] : memref<16x32xf32, #tpu.memory_space<vmem>>, vector<16x32xf32>
    %c0_1 = arith.constant 0 : index
    %c0_2 = arith.constant 0 : index
    %1 = vector.load %arg3[%c0_1, %c0_2] : memref<32x256xf32, #tpu.memory_space<vmem>>, vector<32x256xf32>
    %cst = arith.constant dense<0.000000e+00> : vector<16x256xf32>
    %2 = tpu.matmul %0, %1, %cst {dimension_numbers = #tpu.dot_dimension_numbers<[1], [0], [0], [1], [0, 0, 1, 1], [], []>} : vector<16x32xf32>, vector<32x256xf32>, vector<16x256xf32> -> vector<16x256xf32>
    %c0_3 = arith.constant 0 : index
    %c0_4 = arith.constant 0 : index
    %3 = vector.load %arg4[%c0_3, %c0_4] : memref<1x256xf32, #tpu.memory_space<vmem>>, vector<1x256xf32>
    %4 = vector.broadcast %3 : vector<1x256xf32> to vector<16x256xf32>
    %5 = arith.addf %2, %4 : vector<16x256xf32>
    %c0_5 = arith.constant 0 : index
    %c0_6 = arith.constant 0 : index
    %6 = vector.load %arg5[%c0_5, %c0_6] : memref<16x256xf32, #tpu.memory_space<vmem>>, vector<16x256xf32>
    tpu.vector_store %arg5[%c0_5, %c0_6], %5 {strides = array<i32>} : memref<16x256xf32, #tpu.memory_space<vmem>>, vector<16x256xf32>,
    return
  }
  func.func @transform_0(%arg0: i32, %arg1: i32) -> (i32, i32) {
    %c0_i32 = arith.constant 0 : i32
    %c0_i32_0 = arith.constant 0 : i32
    return %arg0, %c0_i32 : i32, i32
  }
  func.func @transform_1(%arg0: i32, %arg1: i32) -> (i32, i32) {
    %c0_i32 = arith.constant 0 : i32
    %c0_i32_0 = arith.constant 0 : i32
    return %c0_i32, %arg1 : i32, i32
  }
  func.func @transform_2(%arg0: i32, %arg1: i32) -> (i32, i32) {
    %c0_i32 = arith.constant 0 : i32
    %c0_i32_0 = arith.constant 0 : i32
    return %c0_i32, %arg1 : i32, i32
  }
  func.func @transform_3(%arg0: i32, %arg1: i32) -> (i32, i32) {
    %c0_i32 = arith.constant 0 : i32
    return %arg0, %arg1 : i32, i32
  }
}

module attributes {stable_mosaic.version = 11 : i64} {
  func.func @_bilstm_kernel(%arg0: i32, %arg1: i32, %arg2: memref<8x2x128xf32, #tpu.memory_space<vmem>>, %arg3: memref<1x32x128xf32, #tpu.memory_space<vmem>>, %arg4: memref<1x2x32xf32, #tpu.memory_space<vmem>>, %arg5: memref<1x2x32xf32, #tpu.memory_space<vmem>>, %arg6: memref<1x8x2x32xf32, #tpu.memory_space<vmem>>, %arg7: memref<1x2x32xf32, #tpu.memory_space<vmem>>, %arg8: memref<1x2x32xf32, #tpu.memory_space<vmem>>, %arg9: memref<2x32xf32, #tpu.memory_space<vmem>>, %arg10: memref<2x32xf32, #tpu.memory_space<vmem>>) attributes {dimension_semantics = [#tpu.dimension_semantics<parallel>, #tpu.dimension_semantics<arbitrary>], iteration_bounds = array<i64: 2, 8>, scalar_prefetch = 0 : i64, scratch_operands = 2 : i64, tpu.core_type = #tpu.core_type<tc>, window_params = [{transform_indices = @transform_0, window_bounds = array<i64: 8, 2, 128>}, {transform_indices = @transform_1, window_bounds = array<i64: 1, 32, 128>}, {transform_indices = @transform_2, window_bounds = array<i64: 1, 2, 32>}, {transform_indices = @transform_3, window_bounds = array<i64: 1, 2, 32>}, {transform_indices = @transform_4, window_bounds = array<i64: 1, 8, 2, 32>}, {transform_indices = @transform_5, window_bounds = array<i64: 1, 2, 32>}, {transform_indices = @transform_6, window_bounds = array<i64: 1, 2, 32>}]} {
    %c0_i32 = arith.constant 0 : i32
    %0 = arith.cmpi eq, %arg1, %c0_i32 : i32
    %1 = arith.extui %0 : i1 to i32
    %c0_i32_0 = arith.constant 0 : i32
    %2 = arith.cmpi ne, %1, %c0_i32_0 : i32
    scf.if %2 {
      %c0_20 = arith.constant 0 : index
      %c0_21 = arith.constant 0 : index
      %c0_22 = arith.constant 0 : index
      %39 = vector.load %arg4[%c0_20, %c0_21, %c0_22] : memref<1x2x32xf32, #tpu.memory_space<vmem>>, vector<1x2x32xf32>
      %40 = vector.shape_cast %39 : vector<1x2x32xf32> to vector<2x32xf32>
      %c0_23 = arith.constant 0 : index
      %c0_24 = arith.constant 0 : index
      %41 = vector.load %arg9[%c0_23, %c0_24] : memref<2x32xf32, #tpu.memory_space<vmem>>, vector<2x32xf32>
      tpu.vector_store %arg9[%c0_23, %c0_24], %40 {strides = array<i32>} : memref<2x32xf32, #tpu.memory_space<vmem>>, vector<2x32xf32>,
      %c0_25 = arith.constant 0 : index
      %c0_26 = arith.constant 0 : index
      %c0_27 = arith.constant 0 : index
      %42 = vector.load %arg5[%c0_25, %c0_26, %c0_27] : memref<1x2x32xf32, #tpu.memory_space<vmem>>, vector<1x2x32xf32>
      %43 = vector.shape_cast %42 : vector<1x2x32xf32> to vector<2x32xf32>
      %c0_28 = arith.constant 0 : index
      %c0_29 = arith.constant 0 : index
      %44 = vector.load %arg10[%c0_28, %c0_29] : memref<2x32xf32, #tpu.memory_space<vmem>>, vector<2x32xf32>
      tpu.vector_store %arg10[%c0_28, %c0_29], %43 {strides = array<i32>} : memref<2x32xf32, #tpu.memory_space<vmem>>, vector<2x32xf32>,
    } else {
    }
    %c0_i32_1 = arith.constant 0 : i32
    %3 = arith.cmpi eq, %arg0, %c0_i32_1 : i32
    %c7_i32 = arith.constant 7 : i32
    %4 = arith.subi %c7_i32, %arg1 : i32
    %5 = arith.select %3, %arg1, %4 : i32
    %c0 = arith.constant 0 : index
    %c0_2 = arith.constant 0 : index
    %6 = vector.load %arg9[%c0, %c0_2] : memref<2x32xf32, #tpu.memory_space<vmem>>, vector<2x32xf32>
    %c0_3 = arith.constant 0 : index
    %c0_4 = arith.constant 0 : index
    %7 = vector.load %arg10[%c0_3, %c0_4] : memref<2x32xf32, #tpu.memory_space<vmem>>, vector<2x32xf32>
    %8 = arith.index_cast %5 : i32 to index
    %c0_5 = arith.constant 0 : index
    %c0_6 = arith.constant 0 : index
    %9 = vector.load %arg2[%8, %c0_5, %c0_6] : memref<8x2x128xf32, #tpu.memory_space<vmem>>, vector<1x2x128xf32>
    %10 = vector.shape_cast %9 : vector<1x2x128xf32> to vector<2x128xf32>
    %c0_7 = arith.constant 0 : index
    %c0_8 = arith.constant 0 : index
    %c0_9 = arith.constant 0 : index
    %11 = vector.load %arg3[%c0_7, %c0_8, %c0_9] : memref<1x32x128xf32, #tpu.memory_space<vmem>>, vector<1x32x128xf32>
    %12 = vector.shape_cast %11 : vector<1x32x128xf32> to vector<32x128xf32>
    %cst = arith.constant dense<0.000000e+00> : vector<2x128xf32>
    %13 = tpu.matmul %6, %12, %cst {dimension_numbers = #tpu.dot_dimension_numbers<[1], [0], [0], [1], [0, 0, 1, 1], [], []>} : vector<2x32xf32>, vector<32x128xf32>, vector<2x128xf32> -> vector<2x128xf32>
    %14 = arith.addf %10, %13 : vector<2x128xf32>
    %15 = arith.negf %14 : vector<2x128xf32>
    %16 = math.exp %15 : vector<2x128xf32>
    %cst_10 = arith.constant 1.000000e+00 : f32
    %17 = vector.broadcast %cst_10 : f32 to vector<2x128xf32>
    %18 = arith.addf %17, %16 : vector<2x128xf32>
    %19 = arith.divf %17, %18 : vector<2x128xf32>
    %20 = math.tanh %14 : vector<2x128xf32>
    %21 = vector.extract_strided_slice %19 {offsets = [0, 0], sizes = [2, 32], strides = [1, 1]} : vector<2x128xf32> to vector<2x32xf32>
    %22 = vector.extract_strided_slice %19 {offsets = [0, 32], sizes = [2, 32], strides = [1, 1]} : vector<2x128xf32> to vector<2x32xf32>
    %23 = vector.extract_strided_slice %20 {offsets = [0, 64], sizes = [2, 32], strides = [1, 1]} : vector<2x128xf32> to vector<2x32xf32>
    %24 = vector.extract_strided_slice %19 {offsets = [0, 96], sizes = [2, 32], strides = [1, 1]} : vector<2x128xf32> to vector<2x32xf32>
    %25 = arith.mulf %22, %7 : vector<2x32xf32>
    %26 = arith.mulf %21, %23 : vector<2x32xf32>
    %27 = arith.addf %25, %26 : vector<2x32xf32>
    %28 = math.tanh %27 : vector<2x32xf32>
    %29 = arith.mulf %24, %28 : vector<2x32xf32>
    %c0_11 = arith.constant 0 : index
    %c0_12 = arith.constant 0 : index
    %30 = vector.load %arg9[%c0_11, %c0_12] : memref<2x32xf32, #tpu.memory_space<vmem>>, vector<2x32xf32>
    tpu.vector_store %arg9[%c0_11, %c0_12], %29 {strides = array<i32>} : memref<2x32xf32, #tpu.memory_space<vmem>>, vector<2x32xf32>,
    %c0_13 = arith.constant 0 : index
    %c0_14 = arith.constant 0 : index
    %31 = vector.load %arg10[%c0_13, %c0_14] : memref<2x32xf32, #tpu.memory_space<vmem>>, vector<2x32xf32>
    tpu.vector_store %arg10[%c0_13, %c0_14], %27 {strides = array<i32>} : memref<2x32xf32, #tpu.memory_space<vmem>>, vector<2x32xf32>,
    %c0_15 = arith.constant 0 : index
    %32 = arith.index_cast %5 : i32 to index
    %c0_16 = arith.constant 0 : index
    %c0_17 = arith.constant 0 : index
    %33 = vector.load %arg6[%c0_15, %32, %c0_16, %c0_17] : memref<1x8x2x32xf32, #tpu.memory_space<vmem>>, vector<1x1x2x32xf32>
    %34 = vector.shape_cast %33 : vector<1x1x2x32xf32> to vector<2x32xf32>
    %35 = vector.shape_cast %29 : vector<2x32xf32> to vector<1x1x2x32xf32>
    tpu.vector_store %arg6[%c0_15, %32, %c0_16, %c0_17], %35 {strides = array<i32>} : memref<1x8x2x32xf32, #tpu.memory_space<vmem>>, vector<1x1x2x32xf32>,
    %c7_i32_18 = arith.constant 7 : i32
    %36 = arith.cmpi eq, %arg1, %c7_i32_18 : i32
    %37 = arith.extui %36 : i1 to i32
    %c0_i32_19 = arith.constant 0 : i32
    %38 = arith.cmpi ne, %37, %c0_i32_19 : i32
    scf.if %38 {
      %c0_20 = arith.constant 0 : index
      %c0_21 = arith.constant 0 : index
      %c0_22 = arith.constant 0 : index
      %39 = vector.load %arg7[%c0_20, %c0_21, %c0_22] : memref<1x2x32xf32, #tpu.memory_space<vmem>>, vector<1x2x32xf32>
      %40 = vector.shape_cast %39 : vector<1x2x32xf32> to vector<2x32xf32>
      %41 = vector.shape_cast %29 : vector<2x32xf32> to vector<1x2x32xf32>
      tpu.vector_store %arg7[%c0_20, %c0_21, %c0_22], %41 {strides = array<i32>} : memref<1x2x32xf32, #tpu.memory_space<vmem>>, vector<1x2x32xf32>,
      %c0_23 = arith.constant 0 : index
      %c0_24 = arith.constant 0 : index
      %c0_25 = arith.constant 0 : index
      %42 = vector.load %arg8[%c0_23, %c0_24, %c0_25] : memref<1x2x32xf32, #tpu.memory_space<vmem>>, vector<1x2x32xf32>
      %43 = vector.shape_cast %42 : vector<1x2x32xf32> to vector<2x32xf32>
      %44 = vector.shape_cast %27 : vector<2x32xf32> to vector<1x2x32xf32>
      tpu.vector_store %arg8[%c0_23, %c0_24, %c0_25], %44 {strides = array<i32>} : memref<1x2x32xf32, #tpu.memory_space<vmem>>, vector<1x2x32xf32>,
    } else {
    }
    return
  }
  func.func @transform_0(%arg0: i32, %arg1: i32) -> (i32, i32, i32) {
    %c0_i32 = arith.constant 0 : i32
    %c0_i32_0 = arith.constant 0 : i32
    %c0_i32_1 = arith.constant 0 : i32
    return %c0_i32, %c0_i32_0, %arg0 : i32, i32, i32
  }
  func.func @transform_1(%arg0: i32, %arg1: i32) -> (i32, i32, i32) {
    %c0_i32 = arith.constant 0 : i32
    %c0_i32_0 = arith.constant 0 : i32
    %c0_i32_1 = arith.constant 0 : i32
    return %arg0, %c0_i32, %c0_i32_0 : i32, i32, i32
  }
  func.func @transform_2(%arg0: i32, %arg1: i32) -> (i32, i32, i32) {
    %c0_i32 = arith.constant 0 : i32
    %c0_i32_0 = arith.constant 0 : i32
    %c0_i32_1 = arith.constant 0 : i32
    return %arg0, %c0_i32, %c0_i32_0 : i32, i32, i32
  }
  func.func @transform_3(%arg0: i32, %arg1: i32) -> (i32, i32, i32) {
    %c0_i32 = arith.constant 0 : i32
    %c0_i32_0 = arith.constant 0 : i32
    %c0_i32_1 = arith.constant 0 : i32
    return %arg0, %c0_i32, %c0_i32_0 : i32, i32, i32
  }
  func.func @transform_4(%arg0: i32, %arg1: i32) -> (i32, i32, i32, i32) {
    %c0_i32 = arith.constant 0 : i32
    %c0_i32_0 = arith.constant 0 : i32
    %c0_i32_1 = arith.constant 0 : i32
    %c0_i32_2 = arith.constant 0 : i32
    return %arg0, %c0_i32, %c0_i32_0, %c0_i32_1 : i32, i32, i32, i32
  }
  func.func @transform_5(%arg0: i32, %arg1: i32) -> (i32, i32, i32) {
    %c0_i32 = arith.constant 0 : i32
    %c0_i32_0 = arith.constant 0 : i32
    %c0_i32_1 = arith.constant 0 : i32
    return %arg0, %c0_i32, %c0_i32_0 : i32, i32, i32
  }
  func.func @transform_6(%arg0: i32, %arg1: i32) -> (i32, i32, i32) {
    %c0_i32 = arith.constant 0 : i32
    %c0_i32_0 = arith.constant 0 : i32
    %c0_i32_1 = arith.constant 0 : i32
    return %arg0, %c0_i32, %c0_i32_0 : i32, i32, i32
  }
}

</mosaic_0001>

<bundles_post_ra>
// kernel: rnn_model_forward.5
= control target key start
LH: loop header
LB: loop body
LE: loop exit
PB: predicated region body
PF: predicated region fallthrough
CT: control target
= control target key end

     0   :  { %vm32_vm0 = vcmask 523264   ;;  %s250_s0 = inlined_call_operand.vmem [shape: f32[16,64], index: 0, kind: input, shape index: {}]   ;;  %s251_s1 = inlined_call_operand.vmem [shape: f32[64,128], index: 1, kind: input, shape index: {}]   ;;  %s252_s2 = inlined_call_operand.vmem [shape: f32[1,128], index: 2, kind: input, shape index: {}]   ;;  %s253_s3 = inlined_call_operand.hbm [shape: f32[16,128], index: 3, kind: output, shape index: {}]  }
   0x1   :  { %v24_v0 = vld [vmem:[%s251_s1 + $0x38] sm:$0xff]  ;;  %v23_v1 = vld [vmem:[%s251_s1 + $0x30] sm:$0xff]  ;;  %v22_v2 = vld [vmem:[%s251_s1 + $0x28] sm:$0xff] }
   0x2   :  { %145 = vmatprep.subr.mxu0 %v24_v0  ;;  %v15_v3 = vld [vmem:[%s250_s0] sm:$0xff] }
   0x3   :  { %146 = vmatpush3.msra.mxu0 %v24_v0  ;;  %161 = vmatprep.mubr.msk.f32.mxu0 %vm32_vm0, %v15_v3 }
   0x4   :  { %147 = vmatprep.subr.mxu0 %v23_v1 }
   0x5   :  { %8 = vsyncpa [#allocation3], 0  ;;  %148 = vmatpush3.msra.mxu0 %v23_v1  ;;  %v21_v4 = vld [vmem:[%s251_s1 + $0x20] sm:$0xff]  ;;  %v20_v5 = vld [vmem:[%s251_s1 + $0x18] sm:$0xff]  ;;  %s189_s7 = smov [#allocation2]  }
   0x6   :  { %149 = vmatprep.subr.mxu0 %v22_v2  ;;  %v19_v6 = vld [vmem:[%s251_s1 + $0x10] sm:$0xff]  ;;  %v18_v7 = vld [vmem:[%s251_s1 + $0x8] sm:$0xff]  ;;  %v17_v8 = vld [vmem:[%s251_s1] sm:$0xff]  ;;  %s121_s8 = sshll.u32 %s189_s7, 4  ;;  %s122_s8 = int_to_ptr.vmem [resolvable:$true] %s121_s8 }
   0x7   :  { %150 = vmatpush3.msra.mxu0 %v22_v2  ;;  %v16_v9 = vld [vmem:[%s250_s0 + $0x8] sm:$0xff]  ;;  %v132_v10 = vld [vmem:[%s252_s2] ss:$0 sm:$0xff]  ;;  %s167_s1 = scalar_lea.vmem %s122_s8, 256  ;;  %p172_p1 = scmp.lt.s32.totalorder %s122_s8, %s122_s8 }
   0x8   :  { %151 = vmatprep.subr.mxu0 %v21_v4  ;;  %p168_p0 = scmp.ne.s32.totalorder %s122_s8, %s167_s1  ;;  %p173_p2 = scmp.lt.s32.totalorder %s167_s1, %s167_s1 }
   0x9   :  { %152 = vmatpush3.msra.mxu0 %v21_v4 }
   0xa   :  { %153 = vmatprep.subr.mxu0 %v20_v5  ;;  %p174_p3 = por %p173_p2, %p172_p1 }
   0xb   :  { %154 = vmatpush3.msra.mxu0 %v20_v5 }
   0xc   :  { %155 = vmatprep.subr.mxu0 %v19_v6  ;;  %p175_p4 = pnand %p174_p3, %p168_p0 }
   0xd   :  { %156 = vmatpush3.msra.mxu0 %v19_v6 }
   0xe   :  { %157 = vmatprep.subr.mxu0 %v18_v7 }
   0xf   :  { %158 = vmatpush3.msra.mxu0 %v18_v7 }
  0x10   :  { %159 = vmatprep.subr.mxu0 %v17_v8 }
  0x11   :  { %160 = vmatpush3.msra.mxu0 %v17_v8 }
  0x12   :  { %162 = vmatmul.mubr.msk.f32.vlgmr.msra.gmra.mxu0 %vm32_vm0, %v16_v9 }
  0xd2   :  { %v163_v11 = vpop.f32.mrf.mxu0 }
  0xd3   :  { %v111_v12 = vadd.f32 %v163_v11, %v132_v10 }
  0xd4   :  { %v105_v13 = vpop.f32.mrf.mxu0 }
  0xd5   :  { %115 = vst [vmem:[#allocation2 + $0x8] sm:$0xff] %v111_v12  ;;  %v106_v14 = vadd.f32 %v132_v10, %v105_v13 }
  0xd7   :  { %114 = vst [vmem:[#allocation2] sm:$0xff] %v106_v14 }
  0xd8   :  { %178 = shalt.err (!%p175_p4)
}
  0xd9   :  { %s190_s0 = smov 128   ;;  %s191_s9 = smov 8  }
  0xda   :  { %127 = dma.vmem_to_hbm [thread:$0]  %s122_s8, 256, %s253_s3, [#allocation3], %s190_s0, %s190_s0, %s191_s9  }
  0xdb   :  { %187 = dma.done.wait [#allocation3], 256  }
  0xdc   :  { %188 = vsyncadd [#allocation3], 4294967040 }
  0xdd   :  { %131 = vsyncpa [#allocation3], 1 }

// kernel: rnn_model_forward.3
= control target key start
LH: loop header
LB: loop body
LE: loop exit
PB: predicated region body
PF: predicated region fallthrough
CT: control target
= control target key end

     0   :  { %v139_v3 = vmov 0.0   ;;  %vm36_vm0 = vcmask 261120   ;;  %v26_v11 = vlaneseq  ;;  %s205_s1 = inlined_call_operand.vmem [shape: f32[32,256], index: 1, kind: input, shape index: {}]   ;;  %s206_s0 = inlined_call_operand.vmem [shape: f32[16,32], index: 0, kind: input, shape index: {}]   ;;  %s207_s2 = inlined_call_operand.vmem [shape: f32[1,256], index: 2, kind: input, shape index: {}]   ;;  %s208_s3 = inlined_call_operand.vmem [shape: f32[16,256], index: 3, kind: output, shape index: {}]  }
   0x1   :  { %v23_v0 = vld [vmem:[%s205_s1 + $0x38] sm:$0xff]  ;;  %v22_v1 = vld [vmem:[%s205_s1 + $0x30] sm:$0xff]  ;;  %v21_v2 = vld [vmem:[%s205_s1 + $0x28] sm:$0xff]  ;;  %107 = vmatprep.mubr.f32.mxu0 %v139_v3  ;;  %113 = vmatprep.mubr.f32.mxu1 %v139_v3 }
   0x2   :  { %67 = vmatprep.subr.mxu0 %v23_v0  ;;  %130 = vmatprep.subr.mxu1 %v23_v0  ;;  %v20_v4 = vld [vmem:[%s205_s1 + $0x20] sm:$0xff]  ;;  %v19_v5 = vld [vmem:[%s205_s1 + $0x18] sm:$0xff]  ;;  %v18_v6 = vld [vmem:[%s205_s1 + $0x10] sm:$0xff]  ;;  %v27_v12 = vshrl.u32 %v26_v11, 7 }
   0x3   :  { %68 = vmatpush1.msra.mxu0 %v22_v1  ;;  %134 = vmatpush1.msra.mxu1 %v22_v1  ;;  %v17_v7 = vld [vmem:[%s205_s1 + $0x8] sm:$0xff]  ;;  %v16_v8 = vld [vmem:[%s205_s1] sm:$0xff] }
   0x4   :  { %69 = vmatprep.subr.mxu0 %v21_v2  ;;  %131 = vmatprep.subr.mxu1 %v21_v2  ;;  %v14_v9 = vld [vmem:[%s206_s0] sm:$0xff]  ;;  %v15_v10 = vld [vmem:[%s206_s0 + $0x8] sm:$0xff]  ;;  %v28_v13 = vsub.s32 0, %v27_v12  ;;  %v32_v15 = vsub.s32 1, %v27_v12 }
   0x5   :  { %70 = vmatpush1.msra.mxu0 %v20_v4  ;;  %135 = vmatpush1.msra.mxu1 %v20_v4  ;;  %v24_v14 = vld [vmem:[%s207_s2] sm:$0x3] }
   0x6   :  { %71 = vmatprep.subr.mxu0 %v19_v5  ;;  %132 = vmatprep.subr.mxu1 %v19_v5  ;;  %v29_v16 = vrot.slane %v24_v14, %v28_v13  ;;  %v33_v17 = vrot.slane %v24_v14, %v32_v15 }
   0x7   :  { %72 = vmatpush1.msra.mxu0 %v18_v6  ;;  %136 = vmatpush1.msra.mxu1 %v18_v6 }
   0x8   :  { %73 = vmatprep.subr.mxu0 %v17_v7  ;;  %133 = vmatprep.subr.mxu1 %v17_v7 }
   0x9   :  { %74 = vmatpush1.msra.mxu0 %v16_v8  ;;  %137 = vmatpush1.msra.mxu1 %v16_v8 }
   0xa   :  { %128 = vmatmul.mubr.msk.f32.vlgmr.msra.gmra.mxu0 %vm36_vm0, %v14_v9  ;;  %129 = vmatmul.mubr.msk.f32.vlgmr.msra.gmra.mxu1 %vm36_vm0, %v15_v10 }
  0xca   :  { %v109_v18 = vpop.f32.mrf.mxu0  ;;  %v115_v19 = vpop.f32.mrf.mxu1 }
  0xcb   :  { %v110_v20 = vadd.f32 %v109_v18, %v29_v16  ;;  %v116_v21 = vadd.f32 %v115_v19, %v29_v16 }
  0xcc   :  { %v111_v22 = vpop.f32.mrf.mxu0  ;;  %v117_v23 = vpop.f32.mrf.mxu1 }
  0xcd   :  { %120 = vst [vmem:[%s208_s3] sm:$0xff] %v110_v20  ;;  %122 = vst [vmem:[%s208_s3 + $0x10] sm:$0xff] %v116_v21  ;;  %v112_v24 = vadd.f32 %v111_v22, %v33_v17  ;;  %v118_v25 = vadd.f32 %v117_v23, %v33_v17 }
  0xcf   :  { %121 = vst [vmem:[%s208_s3 + $0x8] sm:$0xff] %v112_v24  ;;  %123 = vst [vmem:[%s208_s3 + $0x18] sm:$0xff] %v118_v25 }

// kernel: rnn_model_forward.4
= control target key start
LH: loop header
LB: loop body
LE: loop exit
PB: predicated region body
PF: predicated region fallthrough
CT: control target
= control target key end

     0   :  { %s1258_s0 = inlined_call_operand.vmem [shape: f32[8,2,256], index: 0, kind: input, shape index: {}]   ;;  %s1259_s1 = inlined_call_operand.vmem [shape: f32[2,32,128], index: 1, kind: input, shape index: {}]   ;;  %s1260_s2 = inlined_call_operand.vmem [shape: f32[2,2,32], index: 2, kind: input, shape index: {}]   ;;  %s1261_s3 = inlined_call_operand.vmem [shape: f32[2,2,32], index: 3, kind: input, shape index: {}]   ;;  %s1262_s4 = inlined_call_operand.vmem [shape: f32[2,8,2,32], index: 4, kind: output, shape index: {0}]   ;;  %s1263_s5 = inlined_call_operand.hbm [shape: f32[2,2,32], index: 5, kind: output, shape index: {1}]   ;;  %s1264_s6 = inlined_call_operand.hbm [shape: f32[2,2,32], index: 6, kind: output, shape index: {2}]  }
   0x1   :  { %1272 = sst [smem:[#allocation20_spill]] %s1258_s0 }
   0x2   :  { %12 = vsyncpa [#allocation6], 0 }
   0x3   :  { %14 = vsyncpa [#allocation6 + $0x1], 0 }
   0x4   :  { %15 = vsyncpa [#allocation8], 0 }
   0x5   :  { %17 = vsyncpa [#allocation8 + $0x1], 0  ;;  %s1066_s21 = smov 0   ;;  %s1068_s22 = smov 0  }
   0x6   :  { %s1070_s23 = smov 0   ;;  %s1072_s24 = smov 0  }
   0x7   :  { %s1074_s25 = smov 0   ;;  %s1076_s26 = smov 0  }
   0x8   :  { %s1078_s27 = smov 0   ;;  %s1080_s28 = smov 0  }
   0x9 LB: > { %1273 = sst [smem:[#allocation11_spill]] %s994_s21  ;;  %s766_s29 = sadd.s32 4294967295, %s1022_s28   ;;  %s1022_s28 = sphi %s1080_s28, %s23_s28   ;;  %s1018_s27 = sphi %s1078_s27, %s1294_s27   ;;  %s1014_s26 = sphi %s1076_s26, %s1293_s26   ;;  %s1010_s25 = sphi %s1074_s25, %s1292_s25   ;;  %s1006_s24 = sphi %s1072_s24, %s1291_s24   ;;  %s1002_s23 = sphi %s1070_s23, %s1290_s23   ;;  %s998_s22 = sphi %s1068_s22, %s1289_s22   ;;  %s994_s21 = sphi %s1066_s21, %s1288_s21  }
   0xa   : > { %1274 = sst [smem:[#allocation12_spill]] %s998_s22  ;;  %s767_s30 = sadd.s32 4294967294, %s1022_s28  }
   0xb   : > { %1275 = sst [smem:[#allocation13_spill]] %s1002_s23  ;;  %s32_s7 = sadd.s32 1, %s1014_s26 }
   0xc   : > { %1276 = sst [smem:[#allocation14_spill]] %s1014_s26  ;;  %p33_p0 = scmp.ge.s32.totalorder %s32_s7, 8 }
   0xd   : > { %1277 = sst [smem:[#allocation15_spill]] %s1018_s27  ;;  %s35_s8 = sadd.s32 1, %s1018_s27 }
   0xe   : > { %p49_p1 = scmp.ne.s32.totalorder %s1002_s23, %s998_s22  ;;  %p50_p2 = scmp.eq.s32.totalorder %s1022_s28, 0 }
   0xf   : > { %s1296_s7 = smov (%p33_p0, %s32_s7), 0  ;;  %s1298_s8 = smov (!%p33_p0, %s35_s8), %s1018_s27 }
  0x10   : > { %1278 = sst [smem:[#allocation16_spill]] %s1296_s7  ;;  %p1116_p3 = por %p50_p2, %p49_p1 }
  0x11   : > { %p183_p4 = scmp.eq.s32.totalorder %s766_s29, 15  ;;  %p37_p5 = scmp.ge.s32.totalorder %s1298_s8, 2 }
  0x12   : > { %p188_p6 = scmp.ne.s32.totalorder %s998_s22, %s994_s21  ;;  %p189_p8 = scmp.eq.s32.totalorder %s767_s30, 15 }
  0x13   : > { %p1122_p7 = por %p183_p4, %p49_p1  ;;  %s1300_s8 = smov (%p37_p5, %s1298_s8), 0 }
  0x14   : > { %1281 = sst [smem:[#allocation17_spill]] %s1300_s8  ;;  %p1128_p9 = por %p189_p8, %p188_p6 }
  0x15   : > { %s39_s12 = ssub.s32 %s1018_s27, %s1300_s8  ;;  %s42_s13 = sadd.s32 1, %s1002_s23 }
  0x16   : > { %s1282_s11 = scalar_select %p1128_p9, 1, 0 }
  0x17   : > { %p40_p10 = scmp.eq.s32.totalorder %s39_s12, 0  ;;  %p769_p11 = scmp.ge.s32.totalorder %s1022_s28, 16 }
  0x18   : > { %1283 = sst [smem:[#allocation18_spill]] %s1282_s11 }
  0x19   : > { %s1136_s14 = scalar_select %p40_p10, %s1002_s23, %s42_s13  }
  0x1a   : > { %231 = sbr.rel (%p769_p11) target bundleno = 46 (0x2e), region = 16 }
  0x1b   : > { %1284 = sst [smem:[#allocation19_spill]] %s1136_s14 }
  0x1f   : > { %234 = sbr.rel (!%p1116_p3) target bundleno = 46 (0x2e), region = 20  ;;  %s236_s15 = sand.u32 (%p1116_p3), 1, %s1002_s23  }
  0x20   : > { %s771_s16 = sshll.u32 (%p1116_p3), %s1018_s27, 1  ;;  %s770_s17 = sshll.u32 (%p1116_p3), %s236_s15, 4 }
  0x21   : > { %s1285_s0 = sld [smem:[#allocation20_spill]] (%p1116_p3)  ;;  %s238_s29 = scalar_lea.vmem (%p1116_p3), [#allocation4], %s770_s17 }
  0x27   : > { %s240_s20 = scalar_lea.vmem %s1285_s0, %s771_s16 }
  0x28   : > { %v257_v0 = vld [vmem:[%s240_s20] sm:$0x3]  ;;  %v259_v1 = vld [vmem:[%s240_s20 + $0x4] sm:$0x3]  ;;  %v261_v2 = vld [vmem:[%s240_s20 + $0x8] sm:$0x3] }
  0x29   : > { %258 = vst [vmem:[%s238_s29] sm:$0x3] %v257_v0  ;;  %260 = vst [vmem:[%s238_s29 + $0x2] sm:$0x3] %v259_v1  ;;  %v263_v3 = vld [vmem:[%s240_s20 + $0xc] sm:$0x3] }
  0x2a   : > { %v265_v4 = vld [vmem:[%s240_s20 + $0x10] sm:$0x3]  ;;  %262 = vst [vmem:[%s238_s29 + $0x4] sm:$0x3] %v261_v2  ;;  %264 = vst [vmem:[%s238_s29 + $0x6] sm:$0x3] %v263_v3 }
  0x2b   : > { %266 = vst [vmem:[%s238_s29 + $0x8] sm:$0x3] %v265_v4  ;;  %v267_v5 = vld [vmem:[%s240_s20 + $0x14] sm:$0x3]  ;;  %v269_v6 = vld [vmem:[%s240_s20 + $0x18] sm:$0x3] }
  0x2c   : > { %v271_v7 = vld [vmem:[%s240_s20 + $0x1c] sm:$0x3]  ;;  %268 = vst [vmem:[%s238_s29 + $0xa] sm:$0x3] %v267_v5  ;;  %270 = vst [vmem:[%s238_s29 + $0xc] sm:$0x3] %v269_v6 }
  0x2d   : > { %272 = vst [vmem:[%s238_s29 + $0xe] sm:$0x3] %v271_v7 }
  0x2e PF: > { %p772_p12 = scmp.ge.s32.totalorder %s1022_s28, 1  ;;  %p333_p13 = scmp.lt.s32.totalorder %s1022_s28, 17 }
  0x30   : > { %p334_p0 = pnand %p772_p12, %p333_p13 }
  0x31   : > { %s1149_s30 = sand.u32 (!%p334_p0), 1, %s998_s22   ;;  %p392_p1 = scmp.lt.s32.totalorder (!%p334_p0), %s1010_s25, 1 }
  0x32   : > { %337 = sbr.rel (%p334_p0) target bundleno = 810 (0x32a), region = 73  ;;  %s773_s9 = sshll.u32 (!%p334_p0), %s1149_s30, 4 }
  0x33   : > { %s774_s12 = sshll.u32 (!%p334_p0), %s1149_s30, 1  ;;  %s1169_s11 = scalar_lea.vmem (!%p334_p0), [#allocation4], %s773_s9 }
  0x34   : > { %s1171_s21 = scalar_lea.vmem (!%p334_p0), [#allocation5], %s774_s12  ;;  %s1173_s17 = scalar_lea.vmem (!%p334_p0), [#allocation7], %s774_s12 }
  0x35   : > { %p782_p2 = scmp.ne.s32.totalorder (!%p334_p0), %s1006_s24, 0 }
  0x37   : > { %s393_s13 = scalar_select %p392_p1, %s1010_s25, 1 }
  0x38   : > { %413 = sbr.rel (%p782_p2) target bundleno = 64 (0x40), region = 81 }
  0x39   : > { %s793_s15 = sshll.u32 %s393_s13, 5  ;;  %s778_s16 = sshll.u32 %s393_s13, 1 }
  0x3a   : > { %s396_s19 = scalar_lea.vmem %s1259_s1, %s793_s15  ;;  %s400_s0 = scalar_lea.vmem %s1260_s2, %s778_s16 }
  0x3b   : > { %s404_s27 = scalar_lea.vmem %s1261_s3, %s778_s16  ;;  %s794_s26 = sshll.u32 %s393_s13, 4 }
  0x3c   : > { %s1167_s22 = scalar_lea.vmem %s1262_s4, %s794_s26 }
  0x3d   : > { %v414_v8 = vld [vmem:[%s400_s0] sm:$0x3]  ;;  %vm415_vm0 = vcmask 254976  }
  0x3e   : > { %v417_v9 = vld [vmem:[%s404_s27] sm:$0x3]  ;;  %416 = vst.msk [vmem:[#allocation2] sm:$0x3] %vm415_vm0, %v414_v8 }
  0x3f   : > { %418 = vst.msk [vmem:[#allocation3] sm:$0x3] %vm415_vm0, %v417_v9 }
  0x40 PF: > { %v430_v10 = vld [vmem:[%s396_s19 + $0x18] sm:$0xff]  ;;  %v1024_v11 = vmov 0.0   ;;  %v429_v12 = vld [vmem:[%s396_s19 + $0x10] sm:$0xff]  ;;  %vm1025_vm1 = vmmov 0   ;;  %v428_v13 = vld [vmem:[%s396_s19 + $0x8] sm:$0xff]  ;;  %vm431_vm2 = vcmask 261120  }
  0x41   : > { %800 = vmatprep.subr.mxu0 %v1024_v11  ;;  %808 = vmatprep.mubr.msk.f32.mxu0 %vm1025_vm1, %v1024_v11  ;;  %v427_v14 = vld [vmem:[%s396_s19] sm:$0xff]  ;;  %p419_p3 = scmp.eq.s32.totalorder %s1010_s25, 0  ;;  %s420_s0 = ssub.s32 7, %s1006_s24  ;;  %vm538_vm3 = vcmask 254976  }
  0x42   : > { %801 = vmatpush3.msra.mxu0 %v430_v10  ;;  %s1026_s7 = smov 64   ;;  %s1027_s8 = smov 32  }
  0x43   : > { %802 = vmatprep.subr.mxu0 %v1024_v11  ;;  %s1179_s23 = scalar_select %p419_p3, %s1006_s24, %s420_s0 }
  0x44   : > { %803 = vmatpush3.msra.mxu0 %v429_v12  ;;  %p786_p4 = scmp.ne.s32.totalorder %s1006_s24, 7 }
  0x45   : > { %804 = vmatprep.subr.mxu0 %v1024_v11  ;;  %v422_v15 = vld [vmem:[#allocation2] sm:$0x3]  ;;  %s783_s26 = sshll.u32 %s1179_s23, 1 }
  0x46   : > { %805 = vmatpush3.msra.mxu0 %v428_v13  ;;  %s425_s27 = scalar_lea.vmem %s1169_s11, %s783_s26 [#allocation4]  ;;  %v423_v21 = vld [vmem:[#allocation3] sm:$0x3]  ;;  %s1028_s11 = smov 96  }
  0x47   : > { %806 = vmatprep.subr.mxu0 %v1024_v11  ;;  %v426_v16 = vld [vmem:[%s425_s27] sm:$0x3]  ;;  %s545_s14 = scalar_lea.vmem %s1167_s22, %s783_s26 }
  0x48   : > { %807 = vmatpush3.msra.mxu0 %v427_v14 }
  0x49   : > { %809 = vmatmul.mubr.msk.f32.vlgmr.msra.gmra.mxu0 %vm431_vm2, %v422_v15 }
 0x109   : > { %v501_v17 = vpop.f32.mrf.mxu0 }
 0x10a   : > { %v505_v18 = vadd.f32 %v501_v17, %v426_v16 }
 0x10b   : > { %v810_v19 = vpop.f32.mrf.mxu0 }
 0x10c   : > { %892 = vtanh.f32 %v505_v18  ;;  %v785_v22 = vmul.f32 -1.442695, %v505_v18 }
 0x10e   : > { %894 = vpow2.f32 %v785_v22 }
 0x119   : > { %v893_v20 = vpop.eup %892 }
 0x11a   : > { %519 = vrot.lane.b32.xlu0 %v893_v20, %s1026_s7 }
 0x11b   : > { %v895_v23 = vpop.eup %894 }
 0x11c   : > { %v509_v24 = vadd.f32 1.0, %v895_v23 }
 0x11e   : > { %514 = vrot.lane.b32.xlu0 %v423_v21, %s1027_s8  ;;  %896 = vrcp.f32 %v509_v24 }
 0x12b   : > { %v897_v25 = vpop.eup %896 }
 0x18c   : > { %v520_v26 = vpop.permute.xlu0 %519 }
 0x18d   : > { %v522_v27 = vmul.f32 %v897_v25, %v520_v26 }
 0x18f   : > { %524 = vrot.lane.b32.xlu1 %v522_v27, %s1027_s8 }
 0x190   : > { %v515_v28 = vpop.permute.xlu0 %514 }
 0x191   : > { %v517_v29 = vmul.f32 %v897_v25, %v515_v28 }
 0x201   : > { %v525_v30 = vpop.permute.xlu1 %524 }
 0x202   : > { %v527_v31 = vadd.f32 %v525_v30, %v517_v29 }
 0x204   : > { %898 = vtanh.f32 %v527_v31 }
 0x211   : > { %v899_v32 = vpop.eup %898 }
 0x212   : > { %530 = vrot.lane.b32.xlu1 %v899_v32, %s1026_s7 }
 0x216   : > { %541 = vrot.lane.b32.xlu1 %v527_v31, %s1028_s11 }
 0x284   : > { %v531_v33 = vpop.permute.xlu1 %530 }
 0x285   : > { %v533_v34 = vmul.f32 %v897_v25, %v531_v33 }
 0x287   : > { %535 = vrot.lane.b32.xlu0 %v533_v34, %s1027_s8 }
 0x288   : > { %v542_v35 = vpop.permute.xlu1 %541 }
 0x289   : > { %544 = vst.msk [vmem:[#allocation3] sm:$0x3] %vm538_vm3, %v542_v35 }
 0x2f6   : > { %550 = sbr.rel (%p786_p4) target bundleno = 764 (0x2fc), region = 85 }
 0x2f9   : > { %v536_v36 = vpop.permute.xlu0 %535 }
 0x2fa   : > { %539 = vst.msk [vmem:[#allocation2] sm:$0x3] %vm538_vm3, %v536_v36  ;;  %546 = vst.msk [vmem:[%s545_s14] sm:$0x3] %vm538_vm3, %v536_v36 }
 0x2fb   : > { %551 = vst.msk [vmem:[%s1171_s21] sm:$0x3] %vm538_vm3, %v536_v36  ;;  %552 = vst.msk [vmem:[%s1173_s17] sm:$0x3] %vm538_vm3, %v542_v35 }
 0x2fc PF: > { %s789_s9 = sshll.u32 %s1010_s25, 5  ;;  %s580_s15 = sshll.u32 %s1171_s21, 4  ;;  %s581_s15 = int_to_ptr.vmem [resolvable:$true] %s580_s15 }
 0x2fd   : > { %s578_s13 = scalar_lea.hbm %s1263_s5, %s789_s9  ;;  %s559_s24 = scalar_lea.sflag [#allocation6], %s1149_s30 }
 0x2fe   : > { %s900_s16 = scalar_lea.vmem %s581_s15, 32  ;;  %s1029_s18 = smov [#allocation5]  }
 0x2ff   : > { %p901_p5 = scmp.ne.s32.totalorder %s581_s15, %s900_s16  ;;  %s904_s19 = sshll.u32 %s1029_s18, 4  ;;  %s905_s19 = int_to_ptr.vmem [resolvable:$false] %s904_s19 }
 0x300   : > { %s906_s20 = scalar_lea.vmem %s905_s19, 64  ;;  %p907_p10 = scmp.lt.s32.totalorder %s581_s15, %s905_s19 }
 0x301   : > { %p902_p6 = pnand %p901_p5, %p1122_p7  ;;  %p908_p11 = scmp.lt.s32.totalorder %s906_s20, %s900_s16 }
 0x303   : > { %p903_p8 = pneg %p902_p6  ;;  %p909_p12 = por %p908_p11, %p907_p10 }
 0x305   : > { %p910_p13 = pnand %p909_p12, %p903_p8 }
 0x307   : > { %913 = shalt.err (!%p910_p13)
}
 0x308   : > { %s914_s29 = scalar_lea.hbm %s578_s13, 32  ;;  %s918_s23 = scalar_lea.hbm %s1263_s5, 64 }
 0x309   : > { %p915_p0 = scmp.ne.s32.totalorder %s578_s13, %s914_s29  ;;  %p919_p3 = scmp.lt.s32.totalorder %s578_s13, %s1263_s5 }
 0x30a   : > { %p920_p4 = scmp.lt.s32.totalorder %s918_s23, %s914_s29 }
 0x30b   : > { %p916_p1 = pnand %p915_p0, %p1122_p7 }
 0x30c   : > { %p921_p5 = por %p920_p4, %p919_p3 }
 0x30d   : > { %p917_p2 = pneg %p916_p1 }
 0x30f   : > { %p922_p6 = pnand %p921_p5, %p917_p2 }
 0x311   : > { %925 = shalt.err (!%p922_p6)
}
 0x312   : > { %811 = dma.vmem_to_hbm [thread:$0]  (%p1122_p7), %s581_s15, 32, %s578_s13, %s559_s24  }
 0x313   : > { %s591_s11 = scalar_lea.hbm %s1264_s6, %s789_s9  ;;  %s593_s14 = sshll.u32 %s1173_s17, 4  ;;  %s594_s14 = int_to_ptr.vmem [resolvable:$true] %s593_s14 }
 0x314   : > { %s564_s12 = scalar_lea.sflag [#allocation8], %s1149_s30  ;;  %s926_s22 = scalar_lea.vmem %s594_s14, 32 }
 0x315   : > { %p927_p8 = scmp.ne.s32.totalorder %s594_s14, %s926_s22  ;;  %s1030_s16 = smov [#allocation7]  }
 0x316   : > { %s930_s18 = sshll.u32 %s1030_s16, 4  ;;  %s931_s18 = int_to_ptr.vmem [resolvable:$false] %s930_s18 }
 0x317   : > { %p928_p10 = pnand %p927_p8, %p1122_p7  ;;  %s932_s19 = scalar_lea.vmem %s931_s18, 64 }
 0x318   : > { %p933_p12 = scmp.lt.s32.totalorder %s594_s14, %s931_s18  ;;  %p934_p13 = scmp.lt.s32.totalorder %s932_s19, %s926_s22 }
 0x319   : > { %p929_p11 = pneg %p928_p10 }
 0x31a   : > { %p935_p0 = por %p934_p13, %p933_p12 }
 0x31c   : > { %p936_p1 = pnand %p935_p0, %p929_p11 }
 0x31e   : > { %939 = shalt.err (!%p936_p1)
}
 0x31f   : > { %s940_s25 = scalar_lea.hbm %s591_s11, 32  ;;  %s944_s9 = scalar_lea.hbm %s1264_s6, 64 }
 0x320   : > { %p941_p2 = scmp.ne.s32.totalorder %s591_s11, %s940_s25  ;;  %p945_p5 = scmp.lt.s32.totalorder %s591_s11, %s1264_s6 }
 0x321   : > { %p946_p6 = scmp.lt.s32.totalorder %s944_s9, %s940_s25 }
 0x322   : > { %p942_p3 = pnand %p941_p2, %p1122_p7 }
 0x323   : > { %p947_p8 = por %p946_p6, %p945_p5 }
 0x324   : > { %p943_p4 = pneg %p942_p3 }
 0x326   : > { %p948_p10 = pnand %p947_p8, %p943_p4 }
 0x328   : > { %951 = shalt.err (!%p948_p10)
}
 0x329   : > { %812 = dma.vmem_to_hbm [thread:$0]  (%p1122_p7), %s594_s14, 32, %s591_s11, %s564_s12  }
 0x32a PF: > { %s1286_s24 = sld [smem:[#allocation11_spill]]  ;;  %p822_p11 = scmp.ge.s32.totalorder %s1022_s28, 2 }
 0x32c   : > { %p816_p12 = pnand %p822_p11, %p1128_p9 }
 0x32e   : > { %p817_p13 = pneg %p816_p12 }
 0x330   : > { %s613_s29 = sand.u32 1, %s1286_s24  }
 0x331   : > { %s614_s21 = scalar_lea.sflag [#allocation6], %s613_s29 }
 0x332   : > { %985 = dma.done.wait (%p817_p13), %s614_s21, 32  }
 0x333   : > { %987 = vsyncadd (%p817_p13), %s614_s21, 4294967264  ;;  %s623_s0 = scalar_lea.sflag [#allocation8], %s613_s29 }
 0x334   : > { %989 = dma.done.wait (%p817_p13), %s623_s0, 32  }
 0x335   : > { %991 = vsyncadd (%p817_p13), %s623_s0, 4294967264  ;;  %s23_s28 = sadd.s32 1, %s1022_s28   ;;  %s1288_s21 = sld [smem:[#allocation12_spill]] }
 0x336   : > { %p20_p0 = scmp.ge.s32.totalorder %s23_s28, 18   ;;  %s1289_s22 = sld [smem:[#allocation13_spill]] }
 0x337   : > { %s1290_s23 = sld [smem:[#allocation19_spill]] }
 0x338   : > { %s1291_s24 = sld [smem:[#allocation14_spill]]  ;;  %22 = sbr.rel (!%p20_p0) target bundleno = 9 (0x9), region = 165 }
 0x339   : > { %s1292_s25 = sld [smem:[#allocation15_spill]] }
 0x33a   : > { %s1293_s26 = sld [smem:[#allocation16_spill]] }
 0x33b   : > { %s1294_s27 = sld [smem:[#allocation17_spill]] }
 0x33d   :  { %628 = vsyncpa [#allocation6], 1 }
 0x33e   :  { %630 = vsyncpa [#allocation6 + $0x1], 1 }
 0x33f   :  { %631 = vsyncpa [#allocation8], 1 }
 0x340   :  { %633 = vsyncpa [#allocation8 + $0x1], 1 }

</bundles_post_ra>
